<compile_context>
chip_gen: v6e
topology: v6e:2x2x1
jax: 0.10.0
libtpu: 0.0.40
codegen_flags: <defaults>
</compile_context>

<pallas_src>
import jax
import jax.numpy as jnp
from jax.experimental import pallas as pl
from jax.experimental.pallas import tpu as pltpu

_EPS = 1e-12

_CLIP_MEAN = jnp.array([0.48145466, 0.4578275, 0.40821073], dtype=jnp.float32)
_CLIP_STD = jnp.array([0.26862954, 0.26130258, 0.27577711], dtype=jnp.float32)


# ---------------------------------------------------------------------------
# Pallas kernels
# ---------------------------------------------------------------------------

def _vmem_spec():
    return pl.BlockSpec(memory_space=pltpu.MemorySpace.VMEM)


def _encode_kernel(x_ref, w_ref, b_ref, out_ref):
    # x: (1, D_in) bf16 raw flattened image, w: (D_in, D_emb) bf16 (resize +
    # pixel-affine folded), b: (1, D_emb) f32.  Output: unit-norm enc (1, D_emb).
    enc = jnp.dot(x_ref[...], w_ref[...],
                  preferred_element_type=jnp.float32) + b_ref[...]
    inv_norm = jax.lax.rsqrt(jnp.sum(enc * enc, axis=-1, keepdims=True) + _EPS)
    out_ref[...] = enc * inv_norm


def _fused_forward_kernel(dw_ref, x_ref, w_enc_ref, consts_ref, w_ref, out_ref):
    # dw:      (1, 1)           f32  SMEM scalar (delta_weight)
    # x:       (1, D_in)        bf16 raw flattened CHW image
    # w_enc:   (D_in, D_emb)    bf16 encoder weights, resize + pixel affine folded
    # consts:  (1, 3*D_emb+Wd)  f32  [b_enc | base_img_enc | text_delta | base_w]
    # w:       (1, Wd)          f32  latent
    # out:     (1, 1)           f32  total = clip_loss + dw * mse(w, base_w)
    d_emb = w_enc_ref.shape[1]
    b_enc = consts_ref[:, 0:d_emb]
    base_enc = consts_ref[:, d_emb:2 * d_emb]
    tdelta = consts_ref[:, 2 * d_emb:3 * d_emb]
    base_w = consts_ref[:, 3 * d_emb:]

    # --- image encoding (resize + pixel normalization folded into w_enc/b_enc) ---
    enc = jnp.dot(x_ref[...], w_enc_ref[...],
                  preferred_element_type=jnp.float32) + b_enc
    enc = enc * jax.lax.rsqrt(jnp.sum(enc * enc, axis=-1, keepdims=True) + _EPS)

    # --- directional clip loss ---
    d = enc - base_enc
    d = d * jax.lax.rsqrt(jnp.sum(d * d, axis=-1, keepdims=True) + _EPS)
    clip_loss = 1.0 - jnp.sum(d * tdelta, axis=-1, keepdims=True)

    # --- latent MSE loss ---
    diff = w_ref[...] - base_w
    mse = jnp.sum(diff * diff, axis=-1, keepdims=True) * (1.0 / float(diff.size))

    # --- weighted total, combined in-kernel ---
    # NOTE: (1,1) VMEM output lowers to a masked partial store; sub-microsecond,
    # accepted per review (SMEM scalar output would shave it further).
    out_ref[...] = clip_loss + dw_ref[0, 0] * mse


def encode_image_pallas(x_flat_bf16, w_enc_bf16, b_enc):
    d_emb = w_enc_bf16.shape[1]
    return pl.pallas_call(
        _encode_kernel,
        out_shape=jax.ShapeDtypeStruct((1, d_emb), jnp.float32),
        in_specs=[_vmem_spec(), _vmem_spec(), _vmem_spec()],
        out_specs=_vmem_spec(),
    )(x_flat_bf16, w_enc_bf16, b_enc)


def fused_clip_swap_loss_pallas(delta_weight_11, x_flat_bf16, w_enc_bf16,
                                consts, w2d):
    return pl.pallas_call(
        _fused_forward_kernel,
        out_shape=jax.ShapeDtypeStruct((1, 1), jnp.float32),
        in_specs=[pl.BlockSpec(memory_space=pltpu.MemorySpace.SMEM),  # delta_weight
                  _vmem_spec(),   # x (bf16)
                  _vmem_spec(),   # w_enc (bf16, resize+affine folded)
                  _vmem_spec(),   # packed constants
                  _vmem_spec()],  # w latent
        out_specs=_vmem_spec(),
    )(delta_weight_11, x_flat_bf16, w_enc_bf16, consts, w2d)


# ---------------------------------------------------------------------------
# Module wrapper
# ---------------------------------------------------------------------------

class SoloClipSwapDirLossPallas:
    """Pallas re-implementation of SoloClipSwapDirLoss.forward (fused, jitted)."""

    def __init__(self, base_img, base_gender, base_w, *, resolution=32,
                 embed_dim=128, key=None):
        if key is None:
            key = jax.random.PRNGKey(0)
        k_enc, k_txt = jax.random.split(key)

        self.resolution = resolution
        self.embed_dim = embed_dim
        r = resolution

        # Raw (pre-resize) image geometry is baked into the folded weights.
        # TODO(synk): the fold assumes a static source image shape; the reference
        # resizes arbitrary inputs to the CLIP input resolution.
        _, c_in, h_in, w_in = base_img.shape
        assert c_in == 3
        self.raw_shape = (1, 3, h_in, w_in)
        d_in = 3 * h_in * w_in
        self.d_in = d_in

        # CLIP pixel normalization ((x+1)/2 - mean)/std as a per-channel affine.
        scale_c = 0.5 / _CLIP_STD                      # (3,)
        bias_c = (0.5 - _CLIP_MEAN) / _CLIP_STD        # (3,)
        scale_px = jnp.repeat(scale_c, r * r)          # (3*r*r,)
        bias_px = jnp.repeat(bias_c, r * r)            # (3*r*r,)

        # TODO(synk): CLIP ViT-B/32 image encoder replaced by a deterministic
        # linear projection (no pretrained checkpoint available in-script).
        w_raw = (jax.random.normal(k_enc, (3 * r * r, embed_dim), jnp.float32)
                 / jnp.sqrt(jnp.float32(3 * r * r)))

        # Fold pixel affine:  enc = (x_rs*scale + bias) @ W = x_rs @ (scale⊙W) + bias@W
        w_aff = scale_px[:, None] * w_raw                               # (3*r*r, D)
        b_enc = (bias_px[None, :] @ w_raw).astype(jnp.float32)          # (1, D)

        # Fold bilinear resize (linear map, per channel):  x_rs_c = x_raw_c @ R,
        # with R[p, q] = weight of raw pixel p in resized pixel q.
        # TODO(synk): jax.image.resize bilinear semantics differ slightly from
        # torch.nn.functional.interpolate defaults (align_corners/antialias).
        eye = jnp.eye(h_in * w_in, dtype=jnp.float32).reshape(h_in * w_in, h_in, w_in)
        R = jax.vmap(lambda e: jax.image.resize(e, (r, r), method="bilinear"))(eye)
        R = R.reshape(h_in * w_in, r * r)                               # (HW, r*r)
        w_fold = jnp.concatenate(
            [R @ w_aff[c * r * r:(c + 1) * r * r] for c in range(3)],
            axis=0)                                                     # (3*HW, D)
        self.w_enc_bf16 = w_fold.astype(jnp.bfloat16)
        self.b_enc = b_enc

        # TODO(synk): CLIP text encoder + prompt embellishment replaced by a
        # deterministic unit direction vector.
        td = jax.random.normal(k_txt, (1, embed_dim), jnp.float32)
        td = td / jnp.linalg.norm(td)
        gender = float(base_gender[0])
        assert gender in (0.0, 1.0)
        if gender == 0.0:   # swapped text pairs <=> negated direction
            td = -td
        self.text_delta = td

        # Base image encoding via the same folded Pallas encode kernel.
        base_flat = base_img.astype(jnp.float32).reshape(1, d_in).astype(jnp.bfloat16)
        base_img_enc = encode_image_pallas(base_flat, self.w_enc_bf16, self.b_enc)

        self.base_w2d = base_w.reshape(1, -1).astype(jnp.float32)
        self.w_dim = self.base_w2d.shape[1]

        # Pack all small constants into ONE VMEM input (lane-aligned slices:
        # D_emb and W_dim are multiples of 128 in practice).
        self.consts = jnp.concatenate(
            [self.b_enc, base_img_enc, self.text_delta, self.base_w2d],
            axis=1).astype(jnp.float32)                 # (1, 3*D + W_dim)

        # Single jitted forward: reshape + cast + one fused pallas_call + extract.
        self._forward_jit = jax.jit(self._forward_impl)

    def _forward_impl(self, img, w, delta_weight):
        x_flat = img.astype(jnp.float32).reshape(1, self.d_in).astype(jnp.bfloat16)
        w2d = w.reshape(1, -1).astype(jnp.float32)
        dw = jnp.asarray(delta_weight, jnp.float32).reshape(1, 1)
        total = fused_clip_swap_loss_pallas(
            dw, x_flat, self.w_enc_bf16, self.consts, w2d)
        return total[0, 0]

    def forward(self, img, w, id_weight, delta_weight):
        assert img.shape[0] == 1
        assert tuple(img.shape) == self.raw_shape, "fold assumes static image shape"
        assert w.reshape(1, -1).shape[1] == self.w_dim
        if id_weight > 0.0:
            # TODO(synk): SoloFaceIdLoss needs a pretrained face-ID network
            # (ArcFace); no clean Pallas equivalent — term omitted.
            pass
        # delta_weight * mse is applied unconditionally in-kernel; identical to
        # the reference for delta_weight >= 0 (adds exactly 0 when weight == 0).
        return self._forward_jit(img, w, jnp.float32(delta_weight))

    __call__ = forward


# ---------------------------------------------------------------------------
# Example run
# ---------------------------------------------------------------------------

if __name__ == "__main__":
    key = jax.random.PRNGKey(0)
    k_base_img, k_base_w, k_img, k_w, k_init = jax.random.split(key, 5)

    # inputs (NCHW images in [-1, 1], StyleGAN-like w latent)
    base_img = jax.random.uniform(k_base_img, (1, 3, 16, 16), jnp.float32,
                                  minval=-1.0, maxval=1.0)
    base_w = jax.random.normal(k_base_w, (1, 512), jnp.float32)
    base_gender = jnp.array([1.0], dtype=jnp.float32)

    img = jax.random.uniform(k_img, (1, 3, 16, 16), jnp.float32,
                             minval=-1.0, maxval=1.0)
    w = jax.random.normal(k_w, (1, 512), jnp.float32)

    loss_mod = SoloClipSwapDirLossPallas(base_img, base_gender, base_w,
                                         resolution=32, embed_dim=128,
                                         key=k_init)
    total = loss_mod(img, w, id_weight=0.0, delta_weight=0.5)
    total = jax.block_until_ready(total)
    assert total.shape == () and bool(jnp.isfinite(total))

    # second call exercises the jit cache (no retrace / single launch)
    total2 = jax.block_until_ready(loss_mod(img, w, id_weight=0.0,
                                            delta_weight=0.0))
    assert bool(jnp.isfinite(total2))

    print("KERNEL_OK")
</pallas_src>

<mosaic_0001>
module attributes {stable_mosaic.version = 11 : i64} {
  func.func @_encode_kernel(%arg0: memref<1x768xbf16, #tpu.memory_space<vmem>>, %arg1: memref<768x128xbf16, #tpu.memory_space<vmem>>, %arg2: memref<1x128xf32, #tpu.memory_space<vmem>>, %arg3: memref<1x128xf32, #tpu.memory_space<vmem>>) attributes {dimension_semantics = [], scalar_prefetch = 0 : i64, scratch_operands = 0 : i64, tpu.core_type = #tpu.core_type<tc>} {
    %c0 = arith.constant 0 : index
    %c0_0 = arith.constant 0 : index
    %0 = vector.load %arg0[%c0, %c0_0] : memref<1x768xbf16, #tpu.memory_space<vmem>>, vector<1x768xbf16>
    %c0_1 = arith.constant 0 : index
    %c0_2 = arith.constant 0 : index
    %1 = vector.load %arg1[%c0_1, %c0_2] : memref<768x128xbf16, #tpu.memory_space<vmem>>, vector<768x128xbf16>
    %cst = arith.constant dense<0.000000e+00> : vector<1x128xf32>
    %2 = tpu.matmul %0, %1, %cst {dimension_numbers = #tpu.dot_dimension_numbers<[1], [0], [0], [1], [0, 0, 1, 1], [], []>} : vector<1x768xbf16>, vector<768x128xbf16>, vector<1x128xf32> -> vector<1x128xf32>
    %c0_3 = arith.constant 0 : index
    %c0_4 = arith.constant 0 : index
    %3 = vector.load %arg2[%c0_3, %c0_4] : memref<1x128xf32, #tpu.memory_space<vmem>>, vector<1x128xf32>
    %4 = arith.addf %2, %3 : vector<1x128xf32>
    %5 = arith.mulf %4, %4 : vector<1x128xf32>
    %cst_5 = arith.constant dense<0.000000e+00> : vector<1xf32>
    %6 = vector.multi_reduction <add>, %5, %cst_5 [1] : vector<1x128xf32> to vector<1xf32>
    %7 = vector.shape_cast %6 : vector<1xf32> to vector<1x1xf32>
    %cst_6 = arith.constant 9.99999996E-13 : f32
    %8 = vector.broadcast %cst_6 : f32 to vector<1x1xf32>
    %9 = arith.addf %7, %8 : vector<1x1xf32>
    %10 = math.rsqrt %9 : vector<1x1xf32>
    %11 = vector.broadcast %10 : vector<1x1xf32> to vector<1x128xf32>
    %12 = arith.mulf %4, %11 : vector<1x128xf32>
    %c0_7 = arith.constant 0 : index
    %c0_8 = arith.constant 0 : index
    %13 = vector.load %arg3[%c0_7, %c0_8] : memref<1x128xf32, #tpu.memory_space<vmem>>, vector<1x128xf32>
    tpu.vector_store %arg3[%c0_7, %c0_8], %12 {strides = array<i32>} : memref<1x128xf32, #tpu.memory_space<vmem>>, vector<1x128xf32>,
    return
  }
}

</mosaic_0001>

<bundles_post_ra>
// kernel: tpu_custom_call.1
= control target key start
LH: loop header
LB: loop body
LE: loop exit
PB: predicated region body
PF: predicated region fallthrough
CT: control target
= control target key end

     0   :  { %8 = vsyncpa [#allocation3], 0  ;;  %s902_s0 = inlined_call_operand.hbm [shape: bf16[1,768], index: 0, kind: input, shape index: {}]   ;;  %s903_s1 = inlined_call_operand.hbm [shape: bf16[768,128], index: 1, kind: input, shape index: {}]   ;;  %s904_s2 = inlined_call_operand.vmem [shape: f32[1,128], index: 2, kind: input, shape index: {}]   ;;  %s905_s3 = inlined_call_operand.hbm [shape: f32[1,128], index: 3, kind: output, shape index: {}]  }
   0x1   :  { %9 = vsyncpa [#allocation6], 0 }
   0x2   :  { %10 = vsyncpa [#allocation4], 0  ;;  %s864_s12 = smov [#allocation2]   ;;  %s865_s14 = smov [#allocation5]  }
   0x3   :  { %s17_s13 = sshll.u32 %s864_s12, 4  ;;  %s26_s15 = sshll.u32 %s865_s14, 4  ;;  %s18_s13 = int_to_ptr.vmem [resolvable:$true] %s17_s13  ;;  %s27_s15 = int_to_ptr.vmem [resolvable:$true] %s26_s15 }
   0x4   :  { %s806_s16 = scalar_lea.vmem %s18_s13, 96  ;;  %p811_p1 = scmp.lt.s32.totalorder %s18_s13, %s18_s13 }
   0x5   :  { %p807_p0 = scmp.ne.s32.totalorder %s18_s13, %s806_s16  ;;  %p812_p2 = scmp.lt.s32.totalorder %s806_s16, %s806_s16 }
   0x7   :  { %p813_p3 = por %p812_p2, %p811_p1 }
   0x9   :  { %p814_p4 = pnand %p813_p3, %p807_p0 }
   0xb   :  { %817 = shalt.err (!%p814_p4)
}
   0xc   :  { %20 = dma.hbm_to_vmem [thread:$0]  %s902_s0, 96, %s18_s13, [#allocation3]  }
   0xd   :  { %s826_s19 = scalar_lea.vmem %s27_s15, 6144  ;;  %p831_p6 = scmp.lt.s32.totalorder %s27_s15, %s27_s15 }
   0xe   :  { %p827_p5 = scmp.ne.s32.totalorder %s27_s15, %s826_s19  ;;  %p832_p7 = scmp.lt.s32.totalorder %s826_s19, %s826_s19 }
  0x10   :  { %p833_p8 = por %p832_p7, %p831_p6 }
  0x12   :  { %p834_p9 = pnand %p833_p8, %p827_p5 }
  0x14   :  { %837 = shalt.err (!%p834_p9)
}
  0x15   :  { %s866_s20 = smov 64   ;;  %s867_s21 = smov 4  }
  0x16   :  { %32 = dma.hbm_to_vmem [thread:$0]  %s903_s1, 6144, %s27_s15, [#allocation6], %s866_s20, %s866_s20, %s867_s21  }
  0x17   :  { %858 = dma.done.wait [#allocation3], 96  }
  0x18   :  { %859 = vsyncadd [#allocation3], 4294967200 }
  0x19   :  { %860 = dma.done.wait [#allocation6], 6144  }
  0x1a   :  { %861 = vsyncadd [#allocation6], 4294961152  ;;  %v747_v0 = vld [vmem:[#allocation5 + $0x78] sm:$0xff]   ;;  %v751_v4 = vld [vmem:[#allocation5 + $0x70] sm:$0xff]   ;;  %v868_v21 = vmov 1966171168   ;;  %v145_v23 = vlaneseq }
  0x1b   :  { %v748_v1 = vld [vmem:[#allocation5 + $0x38] sm:$0xff]   ;;  %675 = vmatprep.subr.bf16.mxu0 %v747_v0  ;;  %v752_v5 = vld [vmem:[#allocation5 + $0x30] sm:$0xff]   ;;  %v755_v8 = vld [vmem:[#allocation5 + $0x68] sm:$0xff]   ;;  %v143_v22 = vunpack.c.l.s4 %v868_v21  ;;  %vm603_vm0 = vcmask 1040384   ;;  %s869_s24 = smov [#allocation7]  }
  0x1c   :  { %v749_v2 = vld [vmem:[#allocation5 + $0xf8] sm:$0xff]   ;;  %676 = vmatpush3.bf16.msra.mxu0 %v748_v1  ;;  %v753_v6 = vld [vmem:[#allocation5 + $0xf0] sm:$0xff]   ;;  %v756_v9 = vld [vmem:[#allocation5 + $0x28] sm:$0xff]   ;;  %v146_v29 = vshrl.u32 %v145_v23, 7  ;;  %s617_s25 = sshll.u32 %s869_s24, 4  ;;  %s618_s25 = int_to_ptr.vmem [resolvable:$true] %s617_s25 }
  0x1d   :  { %v750_v3 = vld [vmem:[#allocation5 + $0xb8] sm:$0xff]   ;;  %697 = vmatprep.subr.bf16.mxu1 %v749_v2  ;;  %677 = vmatprep.subr.bf16.mxu0 %v751_v4  ;;  %v754_v7 = vld [vmem:[#allocation5 + $0xb0] sm:$0xff]   ;;  %v757_v10 = vld [vmem:[#allocation5 + $0xe8] sm:$0xff]   ;;  %v144_v28 = vunpack.c.0.s8 %v143_v22  ;;  %s842_s26 = scalar_lea.vmem %s618_s25, 32  ;;  %p843_p11 = scmp.lt.s32.totalorder %s618_s25, %s618_s25 }
  0x1e   :  { %698 = vmatpush3.bf16.msra.mxu1 %v750_v3  ;;  %v758_v11 = vld [vmem:[#allocation5 + $0xa8] sm:$0xff]   ;;  %v759_v12 = vld [vmem:[#allocation5 + $0x60] sm:$0xff]   ;;  %v763_v16 = vld [vmem:[#allocation5 + $0x58] sm:$0xff]  }
  0x1f   :  { %699 = vmatprep.subr.bf16.mxu1 %v753_v6  ;;  %v760_v13 = vld [vmem:[#allocation5 + $0x20] sm:$0xff]   ;;  %v764_v17 = vld [vmem:[#allocation5 + $0x18] sm:$0xff]   ;;  %v767_v20 = vld [vmem:[#allocation5 + $0x50] sm:$0xff]   ;;  %v147_v34 = vsub.s32 %v144_v28, %v146_v29 }
  0x20   :  { %678 = vmatpush3.bf16.msra.mxu0 %v752_v5  ;;  %v761_v14 = vld [vmem:[#allocation5 + $0xe0] sm:$0xff]   ;;  %v765_v18 = vld [vmem:[#allocation5 + $0xd8] sm:$0xff]   ;;  %v768_v24 = vld [vmem:[#allocation5 + $0x10] sm:$0xff]  }
  0x21   :  { %679 = vmatprep.subr.bf16.mxu0 %v755_v8  ;;  %v762_v15 = vld [vmem:[#allocation5 + $0xa0] sm:$0xff]   ;;  %v766_v19 = vld [vmem:[#allocation5 + $0x98] sm:$0xff]   ;;  %v769_v25 = vld [vmem:[#allocation5 + $0xd0] sm:$0xff]  }
  0x22   :  { %700 = vmatpush3.bf16.msra.mxu1 %v754_v7  ;;  %v770_v26 = vld [vmem:[#allocation5 + $0x90] sm:$0xff]   ;;  %v771_v27 = vld [vmem:[#allocation5 + $0x48] sm:$0xff]   ;;  %v775_v33 = vld [vmem:[#allocation5 + $0x40] sm:$0xff]  }
  0x23   :  { %701 = vmatprep.subr.bf16.mxu1 %v757_v10  ;;  %v772_v30 = vld [vmem:[#allocation5 + $0x8] sm:$0xff]   ;;  %v776_v35 = vld [vmem:[#allocation5] sm:$0xff]   ;;  %v42_v37 = vld [vmem:[#allocation2] sm:$0x3f] }
  0x24   :  { %680 = vmatpush3.bf16.msra.mxu0 %v756_v9  ;;  %v773_v31 = vld [vmem:[#allocation5 + $0xc8] sm:$0xff]   ;;  %v777_v36 = vld [vmem:[#allocation5 + $0xc0] sm:$0xff]   ;;  %v141_v38 = vcombine.high %v42_v37, %v42_v37  ;;  %v148_v39 = vrot.slane %v42_v37, %v147_v34  ;;  %v780_v41 = vld [vmem:[#allocation5 + $0x178] sm:$0xff]  }
  0x25   :  { %681 = vmatprep.subr.bf16.mxu0 %v759_v12  ;;  %v774_v32 = vld [vmem:[#allocation5 + $0x88] sm:$0xff]   ;;  %v779_v40 = vld [vmem:[#allocation5 + $0x80] sm:$0xff]   ;;  %v781_v46 = vld [vmem:[#allocation5 + $0x138] sm:$0xff]  }
  0x26   :  { %702 = vmatpush3.bf16.msra.mxu1 %v758_v11  ;;  %v156_v42 = vcombine.high %v148_v39, %v148_v39  ;;  %v164_v43 = vrot.slane %v148_v39, %v147_v34  ;;  %v155_v44 = vrot.slane %v141_v38, %v147_v34  ;;  %v782_v49 = vld [vmem:[#allocation5 + $0x170] sm:$0xff]   ;;  %v784_v53 = vld [vmem:[#allocation5 + $0x168] sm:$0xff]   ;;  %v786_v55 = vld [vmem:[#allocation5 + $0x160] sm:$0xff]  }
  0x27   :  { %703 = vmatprep.subr.bf16.mxu1 %v761_v14  ;;  %v783_v52 = vld [vmem:[#allocation5 + $0x130] sm:$0xff]   ;;  %v785_v54 = vld [vmem:[#allocation5 + $0x128] sm:$0xff]   ;;  %v787_v56 = vld [vmem:[#allocation5 + $0x120] sm:$0xff]  }
  0x28   :  { %682 = vmatpush3.bf16.msra.mxu0 %v760_v13  ;;  %v178_v45 = vrot.slane %v156_v42, %v147_v34  ;;  %v157_v47 = vcombine.high %v155_v44, %v155_v44  ;;  %v186_v48 = vcombine.high %v164_v43, %v164_v43  ;;  %v788_v57 = vld [vmem:[#allocation5 + $0x158] sm:$0xff]   ;;  %v790_v59 = vld [vmem:[#allocation5 + $0x150] sm:$0xff]   ;;  %v792_v61 = vld [vmem:[#allocation5 + $0x148] sm:$0xff]   ;;  %v171_v1 = vrot.slane %v155_v44, %v147_v34 }
  0x29   :  { %683 = vmatprep.subr.bf16.mxu0 %v763_v16  ;;  %v789_v58 = vld [vmem:[#allocation5 + $0x118] sm:$0xff]   ;;  %v791_v60 = vld [vmem:[#allocation5 + $0x110] sm:$0xff]   ;;  %v793_v62 = vld [vmem:[#allocation5 + $0x108] sm:$0xff]  }
  0x2a   :  { %704 = vmatpush3.bf16.msra.mxu1 %v762_v15  ;;  %514 = vmatprep.mubr.bf16.mxu0 %v178_v45  ;;  %v187_v50 = vcombine.high %v178_v45, %v178_v45  ;;  %v185_v51 = vrot.slane %v157_v47, %v147_v34  ;;  %v794_v63 = vld [vmem:[#allocation5 + $0x140] sm:$0xff]   ;;  %v139_v11 = vld [vmem:[%s904_s2] sm:$0x1]  ;;  %s838_s2 = scalar_lea.vmem %s618_s25, 16 }
  0x2b   :  { %705 = vmatprep.subr.bf16.mxu1 %v765_v18  ;;  %v795_v0 = vld [vmem:[#allocation5 + $0x100] sm:$0xff]   ;;  %p839_p10 = scmp.ne.s32.totalorder %s618_s25, %s838_s2  ;;  %p844_p12 = scmp.lt.s32.totalorder %s842_s26, %s838_s2 }
  0x2c   :  { %684 = vmatpush3.bf16.msra.mxu0 %v764_v17  ;;  %554 = vmatprep.mubr.bf16.mxu1 %v187_v50 }
  0x2d   :  { %685 = vmatprep.subr.bf16.mxu0 %v767_v20  ;;  %p845_p13 = por %p844_p12, %p843_p11 }
  0x2e   :  { %706 = vmatpush3.bf16.msra.mxu1 %v766_v19 }
  0x2f   :  { %707 = vmatprep.subr.bf16.mxu1 %v769_v25  ;;  %p846_p0 = pnand %p845_p13, %p839_p10 }
  0x30   :  { %686 = vmatpush3.bf16.msra.mxu0 %v768_v24 }
  0x31   :  { %687 = vmatprep.subr.bf16.mxu0 %v771_v27 }
  0x32   :  { %708 = vmatpush3.bf16.msra.mxu1 %v770_v26 }
  0x33   :  { %709 = vmatprep.subr.bf16.mxu1 %v773_v31 }
  0x34   :  { %688 = vmatpush3.bf16.msra.mxu0 %v772_v30 }
  0x35   :  { %689 = vmatprep.subr.bf16.mxu0 %v775_v33 }
  0x36   :  { %710 = vmatpush3.bf16.msra.mxu1 %v774_v32 }
  0x37   :  { %711 = vmatprep.subr.bf16.mxu1 %v777_v36 }
  0x38   :  { %690 = vmatpush3.bf16.msra.mxu0 %v776_v35 }
  0x39   :  { %719 = vmatprep.subr.bf16.mxu0 %v780_v41 }
  0x3a   :  { %712 = vmatpush3.bf16.msra.mxu1 %v779_v40 }
  0x3b   :  { %515 = vmatmul.mubr.bf16.vlgmr.msra.gmra.mxu0 %v164_v43 }
  0x3c   :  { %720 = vmatpush3.bf16.msra.mxu0 %v781_v46  ;;  %594 = vmatprep.mubr.bf16.mxu0 %v185_v51 }
  0x3d   :  { %555 = vmatmul.mubr.bf16.vlgmr.msra.gmra.mxu1 %v186_v48  ;;  %721 = vmatprep.subr.bf16.mxu0 %v782_v49 }
  0x40   :  { %722 = vmatpush3.bf16.msra.mxu0 %v783_v52 }
  0x41   :  { %723 = vmatprep.subr.bf16.mxu0 %v784_v53 }
  0x44   :  { %724 = vmatpush3.bf16.msra.mxu0 %v785_v54 }
  0x45   :  { %725 = vmatprep.subr.bf16.mxu0 %v786_v55 }
  0x48   :  { %726 = vmatpush3.bf16.msra.mxu0 %v787_v56 }
  0x49   :  { %727 = vmatprep.subr.bf16.mxu0 %v788_v57 }
  0x4c   :  { %728 = vmatpush3.bf16.msra.mxu0 %v789_v58 }
  0x4d   :  { %729 = vmatprep.subr.bf16.mxu0 %v790_v59 }
  0x50   :  { %730 = vmatpush3.bf16.msra.mxu0 %v791_v60 }
  0x51   :  { %731 = vmatprep.subr.bf16.mxu0 %v792_v61 }
  0x54   :  { %732 = vmatpush3.bf16.msra.mxu0 %v793_v62 }
  0x55   :  { %733 = vmatprep.subr.bf16.mxu0 %v794_v63 }
  0x58   :  { %734 = vmatpush3.bf16.msra.mxu0 %v795_v0 }
  0x5b   :  { %595 = vmatmul.mubr.bf16.vlgmr.msra.gmra.mxu0 %v171_v1 }
  0xfb   :  { %v691_v2 = vpop.f32.mrf.mxu0 }
  0xfd   :  { %v692_v3 = vpop.f32.mrf.mxu0  ;;  %v713_v4 = vpop.f32.mrf.mxu1 }
  0xfe   :  { %v693_v10 = vadd.f32 %v692_v3, %v691_v2 }
  0xff   :  { %v694_v5 = vpop.f32.mrf.mxu0  ;;  %v714_v6 = vpop.f32.mrf.mxu1 }
 0x100   :  { %v517_v12 = vadd.f32 %v693_v10, %v139_v11  ;;  %v715_v13 = vadd.f32 %v714_v6, %v713_v4 }
 0x101   :  { %v695_v7 = vpop.f32.mrf.mxu0  ;;  %v716_v8 = vpop.f32.mrf.mxu1 }
 0x102   :  { %v557_v16 = vadd.f32 %v715_v13, %v517_v12 }
 0x103   :  { %v717_v9 = vpop.f32.mrf.mxu1 }
 0x11b   :  { %v735_v14 = vpop.f32.mrf.mxu0 }
 0x11d   :  { %v736_v15 = vpop.f32.mrf.mxu0 }
 0x11e   :  { %v737_v17 = vadd.f32 %v736_v15, %v735_v14 }
 0x11f   :  { %v738_v18 = vpop.f32.mrf.mxu0 }
 0x120   :  { %v597_v19 = vadd.f32 %v737_v17, %v557_v16 }
 0x121   :  { %v739_v20 = vpop.f32.mrf.mxu0 }
 0x122   :  { %v602_v21 = vmul.f32 %v597_v19, %v597_v19 }
 0x124   :  { %v604_v22 = vsel %vm603_vm0, %v602_v21, 0.0 }
 0x125   :  { %605 = vadd.xlane.f32.xlu0 %v604_v22 }
 0x1ae   :  { %v606_v23 = vpop.xlane.xlu0 %605 }
 0x1af   :  { %v607_v24 = vadd.f32 1e-12, %v606_v23 }
 0x1b1   :  { %796 = vrsqrt.f32 %v607_v24 }
 0x1be   :  { %v797_v25 = vpop.eup %796 }
 0x1bf   :  { %v609_v26 = vmul.f32 %v797_v25, %v597_v19 }
 0x1c1   :  { %610 = vst [vmem:[#allocation7] sm:$0x1] %v609_v26 }
 0x1c2   :  { %849 = shalt.err (!%p846_p0)
}
 0x1c3   :  { %620 = dma.vmem_to_hbm [thread:$0]  %s618_s25, 16, %s905_s3, [#allocation4]  }
 0x1c4   :  { %862 = dma.done.wait [#allocation4], 16  }
 0x1c5   :  { %863 = vsyncadd [#allocation4], 4294967280 }
 0x1c6   :  { %624 = vsyncpa [#allocation3], 1 }
 0x1c7   :  { %625 = vsyncpa [#allocation6], 1 }
 0x1c8   :  { %626 = vsyncpa [#allocation4], 1 }

</bundles_post_ra>
